<compile_context>
chip_gen: v7x
topology: tpu7x:2x2x1
jax: 0.10.0
libtpu: 0.0.40
codegen_flags: <defaults>
</compile_context>

<pallas_src>
import numpy as np
import jax
import jax.numpy as jnp
from jax.experimental import pallas as pl
from jax.experimental.pallas import tpu as pltpu

_KSIZE = 3
_PER_STEP_ELEMS = 512 * 1024      # cap on TN*HW per grid step
_MAX_DENSE_HW = 1024              # VMEM guard for the dense (HW, 2*HW) operator


def _build_sobel_operator(H: int, W: int, dtype) -> jnp.ndarray:
    """Dense (H*W, 2*H*W) operator.

    Columns [0, HW) apply sobelKernel3 (gx), columns [HW, 2*HW) apply its
    transpose (gy); PyTorch Conv2d is cross-correlation and replicate padding
    is folded in by clamping the tap positions (taps that clamp onto the same
    pixel are summed)."""
    k3 = np.array([[-1., 0., 1.], [-2., 0., 2.], [-1., 0., 1.]], np.float64) / 2.0
    HW = H * W
    S = np.zeros((HW, 2 * HW), np.float64)
    rows = np.arange(H)
    cols = np.arange(W)
    q_base = np.arange(HW)
    for c, w in enumerate((k3, k3.T)):
        for u in range(3):
            for v in range(3):
                ii = np.clip(rows + u - 1, 0, H - 1)            # replicate pad
                jj = np.clip(cols + v - 1, 0, W - 1)
                p = (ii[:, None] * W + jj[None, :]).ravel()     # input index
                np.add.at(S, (p, c * HW + q_base), w[u, v])
    return jnp.asarray(S, dtype=dtype)


def _make_kernel(compute_dtype):
    """x_ref: (TN, HW) native dtype; s_ref: (HW, 2*HW); o_ref: (TN, 2*HW) f32."""
    def kernel(x_ref, s_ref, o_ref):
        x = x_ref[...]
        if x.dtype != compute_dtype:
            # int8/bool labels go via f32 -> bf16 (safe, exact for label data).
            x = x.astype(jnp.float32).astype(compute_dtype)
        o_ref[...] = jnp.dot(x, s_ref[...], preferred_element_type=jnp.float32)
    return kernel


def _round_up(x: int, m: int) -> int:
    return ((x + m - 1) // m) * m


def _choose_tn(N: int, HW: int, sub: int) -> int:
    """Planes per grid step: multiple of `sub`, <= per-step element cap, and
    small enough to give >=4 (or >=2) grid steps for v7x's two TensorCores and
    pipeline overlap whenever the sublane rule allows it."""
    cap = max(sub, (_PER_STEP_ELEMS // HW) // sub * sub)
    if N >= 4 * sub:
        want = _round_up(pl.cdiv(N, 4), sub)
    elif N >= 2 * sub:
        want = _round_up(pl.cdiv(N, 2), sub)
    else:
        want = _round_up(max(N, 1), sub)
    return max(sub, min(cap, want))


def sobel_label(one_hot_label: jnp.ndarray, ksize: int = _KSIZE) -> jnp.ndarray:
    """one_hot_label: [B, C, H, W] -> [B, C, 2, H, W] float32 (ksize=3)."""
    if ksize != 3:
        raise NotImplementedError("SobelLabel Pallas kernel: only ksize=3")  # TODO(synk)
    B, C, H, W = one_hot_label.shape
    HW = H * W
    assert HW % 128 == 0, "H*W must be a multiple of 128 for lane-dense blocks"
    assert HW <= _MAX_DENSE_HW, (
        "dense Sobel operator would exceed VMEM; use separable band matmuls")  # TODO(synk)

    x = one_hot_label
    if x.dtype == jnp.bool_:
        x = x.astype(jnp.int8)

    # bf16 MXU operands for label-like (int / bf16) inputs — exact for one-hot
    # data; full f32 matmul for generic float inputs to match the torch module.
    if jnp.issubdtype(x.dtype, jnp.floating) and x.dtype != jnp.bfloat16:
        compute_dtype = jnp.float32
    else:
        compute_dtype = jnp.bfloat16

    N = B * C
    x2d = x.reshape(N, HW)                 # contiguous collapse: free

    itemsize = np.dtype(x.dtype).itemsize
    sub = max(8, 32 // itemsize)           # sublane multiple for the input dtype
    TN = _choose_tn(N, HW, sub)
    steps = pl.cdiv(N, TN)
    N_pad = steps * TN
    if N_pad != N:                         # rare: keep blocks sublane-aligned
        x2d = jnp.pad(x2d, ((0, N_pad - N), (0, 0)))

    S = _build_sobel_operator(H, W, compute_dtype)

    s_bytes = 2 * S.size * np.dtype(compute_dtype).itemsize       # double-buffered
    io_bytes = 2 * (TN * HW * itemsize + TN * 2 * HW * 4)          # double-buffered
    vmem_limit = int(min(48 << 20, max(32 << 20, s_bytes + io_bytes + (8 << 20))))

    out = pl.pallas_call(
        _make_kernel(compute_dtype),
        out_shape=jax.ShapeDtypeStruct((N_pad, 2 * HW), jnp.float32),
        grid_spec=pltpu.PrefetchScalarGridSpec(
            num_scalar_prefetch=0,
            grid=(steps,),
            in_specs=[
                pl.BlockSpec((TN, HW), lambda n: (n, 0)),
                pl.BlockSpec((HW, 2 * HW), lambda n: (0, 0)),   # VMEM-resident operator
            ],
            out_specs=pl.BlockSpec((TN, 2 * HW), lambda n: (n, 0)),
        ),
        compiler_params=pltpu.CompilerParams(
            dimension_semantics=("parallel",),
            vmem_limit_bytes=vmem_limit,
        ),
    )(x2d, S)

    if N_pad != N:
        out = out[:N]
    # (N, 2*H*W) row-major == (B, C, 2, H, W) row-major -> free reshape.
    return out.reshape(B, C, 2, H, W)


def _reference(one_hot_label: jnp.ndarray) -> jnp.ndarray:
    """Pure-JAX reference (lax.conv with replicate padding), matches the torch module."""
    B, C, H, W = one_hot_label.shape
    pad = _KSIZE // 2
    kern = jnp.array([[-1., 0., 1.], [-2., 0., 2.], [-1., 0., 1.]], jnp.float32) / 2.0
    w = jnp.stack([kern, kern.T], axis=0)[:, None, :, :]     # [2, 1, 3, 3]
    x = one_hot_label.astype(jnp.float32).reshape(B * C, 1, H, W)
    x = jnp.pad(x, ((0, 0), (0, 0), (pad, pad), (pad, pad)), mode="edge")
    y = jax.lax.conv_general_dilated(
        x, w, window_strides=(1, 1), padding="VALID",
        dimension_numbers=("NCHW", "OIHW", "NCHW"))
    return y.reshape(B, C, 2, H, W)


if __name__ == "__main__":
    key = jax.random.PRNGKey(0)
    B, C, H, W = 2, 4, 16, 16

    # Random one-hot labels (the module's actual input domain), NCHW float32.
    cls = jax.random.randint(key, (B, H, W), 0, C)
    x = jnp.transpose(jax.nn.one_hot(cls, C, dtype=jnp.float32), (0, 3, 1, 2))

    sobel = jax.jit(sobel_label)
    out = sobel(x)
    jax.block_until_ready(out)

    ref = _reference(x)
    assert out.shape == (B, C, 2, H, W)
    assert jnp.allclose(out, ref, atol=1e-5, rtol=1e-5)

    # Native-dtype path: int8 one-hot labels (bf16 MXU operands + N padding).
    out_i8 = jax.jit(sobel_label)(x.astype(jnp.int8))
    jax.block_until_ready(out_i8)
    assert out_i8.shape == (B, C, 2, H, W)
    assert jnp.allclose(out_i8, ref, atol=1e-5, rtol=1e-5)

    print("KERNEL_OK")
</pallas_src>

<mosaic_0001>
module attributes {stable_mosaic.version = 11 : i64} {
  func.func @kernel(%arg0: i32, %arg1: memref<8x256xf32, #tpu.memory_space<vmem>>, %arg2: memref<256x512xf32, #tpu.memory_space<vmem>>, %arg3: memref<8x512xf32, #tpu.memory_space<vmem>>) attributes {dimension_semantics = [#tpu.dimension_semantics<parallel>], iteration_bounds = array<i64: 1>, scalar_prefetch = 0 : i64, scratch_operands = 0 : i64, tpu.core_type = #tpu.core_type<tc>, window_params = [{transform_indices = @transform_0, window_bounds = array<i64: 8, 256>}, {pipeline_mode = #tpu.pipeline_mode<synchronous>, transform_indices = @transform_1, window_bounds = array<i64: 256, 512>}, {transform_indices = @transform_2, window_bounds = array<i64: 8, 512>}]} {
    %c0 = arith.constant 0 : index
    %c0_0 = arith.constant 0 : index
    %0 = vector.load %arg1[%c0, %c0_0] : memref<8x256xf32, #tpu.memory_space<vmem>>, vector<8x256xf32>
    %c0_1 = arith.constant 0 : index
    %c0_2 = arith.constant 0 : index
    %1 = vector.load %arg2[%c0_1, %c0_2] : memref<256x512xf32, #tpu.memory_space<vmem>>, vector<256x512xf32>
    %cst = arith.constant dense<0.000000e+00> : vector<8x512xf32>
    %2 = tpu.matmul %0, %1, %cst {dimension_numbers = #tpu.dot_dimension_numbers<[1], [0], [0], [1], [0, 0, 1, 1], [], []>} : vector<8x256xf32>, vector<256x512xf32>, vector<8x512xf32> -> vector<8x512xf32>
    %c0_3 = arith.constant 0 : index
    %c0_4 = arith.constant 0 : index
    %3 = vector.load %arg3[%c0_3, %c0_4] : memref<8x512xf32, #tpu.memory_space<vmem>>, vector<8x512xf32>
    tpu.vector_store %arg3[%c0_3, %c0_4], %2 {strides = array<i32>} : memref<8x512xf32, #tpu.memory_space<vmem>>, vector<8x512xf32>,
    return
  }
  func.func @transform_0(%arg0: i32) -> (i32, i32) {
    %c0_i32 = arith.constant 0 : i32
    %c0_i32_0 = arith.constant 0 : i32
    return %arg0, %c0_i32 : i32, i32
  }
  func.func @transform_1(%arg0: i32) -> (i32, i32) {
    %c0_i32 = arith.constant 0 : i32
    %c0_i32_0 = arith.constant 0 : i32
    %c0_i32_1 = arith.constant 0 : i32
    return %c0_i32, %c0_i32_0 : i32, i32
  }
  func.func @transform_2(%arg0: i32) -> (i32, i32) {
    %c0_i32 = arith.constant 0 : i32
    %c0_i32_0 = arith.constant 0 : i32
    return %arg0, %c0_i32 : i32, i32
  }
}

</mosaic_0001>

<bundles_post_ra>
// kernel: sobel_label.1
= control target key start
LH: loop header
LB: loop body
LE: loop exit
PB: predicated region body
PF: predicated region fallthrough
CT: control target
= control target key end

     0   :  { %7 = vsyncpa [#allocation3], 0  ;;  %s461_s9 = smov [#allocation2]   ;;  %s509_s0 = inlined_call_operand.vmem [shape: f32[8,256], index: 0, kind: input, shape index: {}]   ;;  %s510_s1 = inlined_call_operand.hbm [shape: f32[256,512], index: 1, kind: input, shape index: {}]   ;;  %s511_s2 = inlined_call_operand.vmem [shape: f32[8,512], index: 2, kind: output, shape index: {}]  }
   0x1   :  { %s15_s10 = sshll.u32 %s461_s9, 4  ;;  %s437_s13 = scalar_lea.hbm %s510_s1, 16384  ;;  %s16_s10 = int_to_ptr.vmem [resolvable:$true] %s15_s10 }
   0x2   :  { %p438_p0 = scmp.ne.s32.totalorder %s510_s1, %s437_s13  ;;  %p441_p1 = scmp.lt.u32.totalorder %s437_s13, %s510_s1 }
   0x4   :  { %p443_p2 = pnand %p441_p1, %p438_p0 }
   0x6   :  { %446 = shalt.err (!%p443_p2)
}
   0x7   :  { %s447_s18 = scalar_lea.vmem %s16_s10, 16384  ;;  %p452_p4 = scmp.lt.s32.totalorder %s16_s10, %s16_s10 }
   0x8   :  { %p448_p3 = scmp.ne.s32.totalorder %s16_s10, %s447_s18  ;;  %p453_p5 = scmp.lt.s32.totalorder %s447_s18, %s447_s18 }
   0xa   :  { %p454_p6 = por %p453_p5, %p452_p4 }
   0xc   :  { %p455_p7 = pnand %p454_p6, %p448_p3 }
   0xe   :  { %458 = shalt.err (!%p455_p7)
}
   0xf   :  { %s462_s19 = smov 512   ;;  %s463_s20 = smov 32  }
  0x10   :  { %21 = dma.hbm_to_vmem [thread:$0]  %s510_s1, 16384, %s16_s10, [#allocation3], %s462_s19, %s462_s19, %s463_s20  }
  0x11   :  { %459 = dma.done.wait [#allocation3], 16384  }
  0x12   :  { %460 = vsyncadd [#allocation3], 4294950912  ;;  %v28_v0 = vld [vmem:[#allocation2 + $0x8] sm:$0xff]  ;;  %v30_v2 = vld [vmem:[#allocation2 + $0x18] sm:$0xff] }
  0x13   :  { %v32_v1 = vld [vmem:[#allocation2 + $0x28] sm:$0xff]  ;;  %v34_v4 = vld [vmem:[#allocation2 + $0x38] sm:$0xff]  ;;  %v27_v5 = vld [vmem:[#allocation2] sm:$0xff] }
  0x14   :  { %v306_v3 = vpack.c.bf16 %v32_v1, %v28_v0  ;;  %v31_v6 = vld [vmem:[#allocation2 + $0x20] sm:$0xff]  ;;  %v370_v7 = vpack.c.bf16 %v34_v4, %v30_v2  ;;  %v29_v9 = vld [vmem:[#allocation2 + $0x10] sm:$0xff]  ;;  %v36_v11 = vld [vmem:[#allocation2 + $0x48] sm:$0xff] }
  0x15   :  { %v308_v8 = vpack.c.bf16 %v31_v6, %v27_v5  ;;  %v33_v10 = vld [vmem:[#allocation2 + $0x30] sm:$0xff]  ;;  %v40_v13 = vld [vmem:[#allocation2 + $0x68] sm:$0xff]  ;;  %v38_v14 = vld [vmem:[#allocation2 + $0x58] sm:$0xff] }
  0x16   :  { %307 = vmatprep.subr.bf16.mxu0 %v306_v3  ;;  %v372_v12 = vpack.c.bf16 %v33_v10, %v29_v9  ;;  %v42_v15 = vld [vmem:[#allocation2 + $0x78] sm:$0xff]  ;;  %371 = vmatprep.subr.bf16.mxu1 %v370_v7  ;;  %v310_v16 = vpack.c.bf16 %v40_v13, %v36_v11  ;;  %v35_v18 = vld [vmem:[#allocation2 + $0x40] sm:$0xff]  ;;  %v37_v20 = vld [vmem:[#allocation2 + $0x50] sm:$0xff] }
  0x17   :  { %309 = vmatpush1.bf16.msra.mxu0 %v308_v8  ;;  %v374_v17 = vpack.c.bf16 %v42_v15, %v38_v14  ;;  %v39_v19 = vld [vmem:[#allocation2 + $0x60] sm:$0xff]  ;;  %v41_v22 = vld [vmem:[#allocation2 + $0x70] sm:$0xff]  ;;  %v44_v23 = vld [vmem:[#allocation2 + $0x88] sm:$0xff] }
  0x18   :  { %373 = vmatpush1.bf16.msra.mxu1 %v372_v12  ;;  %v312_v21 = vpack.c.bf16 %v39_v19, %v35_v18  ;;  %v48_v24 = vld [vmem:[#allocation2 + $0xa8] sm:$0xff]  ;;  %311 = vmatprep.subr.bf16.mxu0 %v310_v16  ;;  %v376_v25 = vpack.c.bf16 %v41_v22, %v37_v20  ;;  %v46_v27 = vld [vmem:[#allocation2 + $0x98] sm:$0xff]  ;;  %v43_v29 = vld [vmem:[#allocation2 + $0x80] sm:$0xff] }
  0x19   :  { %375 = vmatprep.subr.bf16.mxu1 %v374_v17  ;;  %v314_v26 = vpack.c.bf16 %v48_v24, %v44_v23  ;;  %v50_v28 = vld [vmem:[#allocation2 + $0xb8] sm:$0xff]  ;;  %v47_v31 = vld [vmem:[#allocation2 + $0xa0] sm:$0xff]  ;;  %v45_v32 = vld [vmem:[#allocation2 + $0x90] sm:$0xff] }
  0x1a   :  { %v378_v30 = vpack.c.bf16 %v50_v28, %v46_v27  ;;  %v49_v33 = vld [vmem:[#allocation2 + $0xb0] sm:$0xff]  ;;  %v316_v34 = vpack.c.bf16 %v47_v31, %v43_v29  ;;  %v52_v35 = vld [vmem:[#allocation2 + $0xc8] sm:$0xff]  ;;  %v54_v37 = vld [vmem:[#allocation2 + $0xd8] sm:$0xff] }
  0x1b   :  { %313 = vmatpush1.bf16.msra.mxu0 %v312_v21  ;;  %v56_v36 = vld [vmem:[#allocation2 + $0xe8] sm:$0xff]  ;;  %v380_v38 = vpack.c.bf16 %v49_v33, %v45_v32  ;;  %v58_v40 = vld [vmem:[#allocation2 + $0xf8] sm:$0xff]  ;;  %v51_v41 = vld [vmem:[#allocation2 + $0xc0] sm:$0xff] }
  0x1c   :  { %377 = vmatpush1.bf16.msra.mxu1 %v376_v25  ;;  %315 = vmatprep.subr.bf16.mxu0 %v314_v26  ;;  %v318_v39 = vpack.c.bf16 %v56_v36, %v52_v35  ;;  %v55_v42 = vld [vmem:[#allocation2 + $0xe0] sm:$0xff]  ;;  %v382_v43 = vpack.c.bf16 %v58_v40, %v54_v37  ;;  %v53_v44 = vld [vmem:[#allocation2 + $0xd0] sm:$0xff]  ;;  %v60_v46 = vld [vmem:[#allocation2 + $0x108] sm:$0xff] }
  0x1d   :  { %379 = vmatprep.subr.bf16.mxu1 %v378_v30  ;;  %v57_v45 = vld [vmem:[#allocation2 + $0xf0] sm:$0xff]  ;;  %v64_v47 = vld [vmem:[#allocation2 + $0x128] sm:$0xff]  ;;  %v62_v48 = vld [vmem:[#allocation2 + $0x118] sm:$0xff]  ;;  %v320_v50 = vpack.c.bf16 %v55_v42, %v51_v41 }
  0x1e   :  { %v66_v49 = vld [vmem:[#allocation2 + $0x138] sm:$0xff]  ;;  %v384_v51 = vpack.c.bf16 %v57_v45, %v53_v44  ;;  %v322_v52 = vpack.c.bf16 %v64_v47, %v60_v46  ;;  %v59_v53 = vld [vmem:[#allocation2 + $0x100] sm:$0xff]  ;;  %v61_v55 = vld [vmem:[#allocation2 + $0x110] sm:$0xff] }
  0x1f   :  { %317 = vmatpush1.bf16.msra.mxu0 %v316_v34  ;;  %v63_v54 = vld [vmem:[#allocation2 + $0x120] sm:$0xff]  ;;  %v386_v56 = vpack.c.bf16 %v66_v49, %v62_v48  ;;  %v65_v57 = vld [vmem:[#allocation2 + $0x130] sm:$0xff]  ;;  %v68_v58 = vld [vmem:[#allocation2 + $0x148] sm:$0xff] }
  0x20   :  { %381 = vmatpush1.bf16.msra.mxu1 %v380_v38  ;;  %319 = vmatprep.subr.bf16.mxu0 %v318_v39  ;;  %v72_v59 = vld [vmem:[#allocation2 + $0x168] sm:$0xff]  ;;  %v70_v60 = vld [vmem:[#allocation2 + $0x158] sm:$0xff]  ;;  %v324_v62 = vpack.c.bf16 %v63_v54, %v59_v53  ;;  %v388_v63 = vpack.c.bf16 %v65_v57, %v61_v55  ;;  %v67_v1 = vld [vmem:[#allocation2 + $0x140] sm:$0xff] }
  0x21   :  { %383 = vmatprep.subr.bf16.mxu1 %v382_v43  ;;  %v74_v61 = vld [vmem:[#allocation2 + $0x178] sm:$0xff]  ;;  %v326_v0 = vpack.c.bf16 %v72_v59, %v68_v58  ;;  %v71_v2 = vld [vmem:[#allocation2 + $0x160] sm:$0xff]  ;;  %v69_v3 = vld [vmem:[#allocation2 + $0x150] sm:$0xff] }
  0x22   :  { %v390_v4 = vpack.c.bf16 %v74_v61, %v70_v60  ;;  %v73_v5 = vld [vmem:[#allocation2 + $0x170] sm:$0xff]  ;;  %v76_v6 = vld [vmem:[#allocation2 + $0x188] sm:$0xff]  ;;  %v78_v8 = vld [vmem:[#allocation2 + $0x198] sm:$0xff]  ;;  %v328_v10 = vpack.c.bf16 %v71_v2, %v67_v1 }
  0x23   :  { %321 = vmatpush1.bf16.msra.mxu0 %v320_v50  ;;  %v80_v7 = vld [vmem:[#allocation2 + $0x1a8] sm:$0xff]  ;;  %v82_v9 = vld [vmem:[#allocation2 + $0x1b8] sm:$0xff]  ;;  %v392_v11 = vpack.c.bf16 %v73_v5, %v69_v3  ;;  %v75_v13 = vld [vmem:[#allocation2 + $0x180] sm:$0xff] }
  0x24   :  { %385 = vmatpush1.bf16.msra.mxu1 %v384_v51  ;;  %323 = vmatprep.subr.bf16.mxu0 %v322_v52  ;;  %v330_v12 = vpack.c.bf16 %v80_v7, %v76_v6  ;;  %v79_v14 = vld [vmem:[#allocation2 + $0x1a0] sm:$0xff]  ;;  %v77_v15 = vld [vmem:[#allocation2 + $0x190] sm:$0xff]  ;;  %v394_v16 = vpack.c.bf16 %v82_v9, %v78_v8  ;;  %v84_v18 = vld [vmem:[#allocation2 + $0x1c8] sm:$0xff] }
  0x25   :  { %387 = vmatprep.subr.bf16.mxu1 %v386_v56  ;;  %v81_v17 = vld [vmem:[#allocation2 + $0x1b0] sm:$0xff]  ;;  %v88_v19 = vld [vmem:[#allocation2 + $0x1e8] sm:$0xff]  ;;  %v86_v20 = vld [vmem:[#allocation2 + $0x1d8] sm:$0xff]  ;;  %v332_v22 = vpack.c.bf16 %v79_v14, %v75_v13 }
  0x26   :  { %v90_v21 = vld [vmem:[#allocation2 + $0x1f8] sm:$0xff]  ;;  %v396_v23 = vpack.c.bf16 %v81_v17, %v77_v15  ;;  %v334_v24 = vpack.c.bf16 %v88_v19, %v84_v18  ;;  %v83_v25 = vld [vmem:[#allocation2 + $0x1c0] sm:$0xff]  ;;  %v85_v27 = vld [vmem:[#allocation2 + $0x1d0] sm:$0xff] }
  0x27   :  { %325 = vmatpush1.bf16.msra.mxu0 %v324_v62  ;;  %v87_v26 = vld [vmem:[#allocation2 + $0x1e0] sm:$0xff]  ;;  %v398_v28 = vpack.c.bf16 %v90_v21, %v86_v20  ;;  %v89_v29 = vld [vmem:[#allocation2 + $0x1f0] sm:$0xff]  ;;  %v92_v30 = vld [vmem:[#allocation2 + $0x208] sm:$0xff] }
  0x28   :  { %389 = vmatpush1.bf16.msra.mxu1 %v388_v63  ;;  %327 = vmatprep.subr.bf16.mxu0 %v326_v0  ;;  %v96_v31 = vld [vmem:[#allocation2 + $0x228] sm:$0xff]  ;;  %v94_v32 = vld [vmem:[#allocation2 + $0x218] sm:$0xff]  ;;  %v336_v34 = vpack.c.bf16 %v87_v26, %v83_v25  ;;  %v400_v35 = vpack.c.bf16 %v89_v29, %v85_v27  ;;  %v91_v37 = vld [vmem:[#allocation2 + $0x200] sm:$0xff] }
  0x29   :  { %391 = vmatprep.subr.bf16.mxu1 %v390_v4  ;;  %v98_v33 = vld [vmem:[#allocation2 + $0x238] sm:$0xff]  ;;  %v338_v36 = vpack.c.bf16 %v96_v31, %v92_v30  ;;  %v95_v38 = vld [vmem:[#allocation2 + $0x220] sm:$0xff]  ;;  %v93_v39 = vld [vmem:[#allocation2 + $0x210] sm:$0xff] }
  0x2a   :  { %v402_v40 = vpack.c.bf16 %v98_v33, %v94_v32  ;;  %v97_v41 = vld [vmem:[#allocation2 + $0x230] sm:$0xff]  ;;  %v100_v42 = vld [vmem:[#allocation2 + $0x248] sm:$0xff]  ;;  %v102_v44 = vld [vmem:[#allocation2 + $0x258] sm:$0xff]  ;;  %v340_v46 = vpack.c.bf16 %v95_v38, %v91_v37 }
  0x2b   :  { %329 = vmatpush1.bf16.msra.mxu0 %v328_v10  ;;  %v104_v43 = vld [vmem:[#allocation2 + $0x268] sm:$0xff]  ;;  %v106_v45 = vld [vmem:[#allocation2 + $0x278] sm:$0xff]  ;;  %v404_v47 = vpack.c.bf16 %v97_v41, %v93_v39  ;;  %v99_v49 = vld [vmem:[#allocation2 + $0x240] sm:$0xff] }
  0x2c   :  { %393 = vmatpush1.bf16.msra.mxu1 %v392_v11  ;;  %331 = vmatprep.subr.bf16.mxu0 %v330_v12  ;;  %v342_v48 = vpack.c.bf16 %v104_v43, %v100_v42  ;;  %v103_v50 = vld [vmem:[#allocation2 + $0x260] sm:$0xff]  ;;  %v101_v51 = vld [vmem:[#allocation2 + $0x250] sm:$0xff]  ;;  %v406_v52 = vpack.c.bf16 %v106_v45, %v102_v44  ;;  %v108_v54 = vld [vmem:[#allocation2 + $0x288] sm:$0xff] }
  0x2d   :  { %395 = vmatprep.subr.bf16.mxu1 %v394_v16  ;;  %v105_v53 = vld [vmem:[#allocation2 + $0x270] sm:$0xff]  ;;  %v112_v55 = vld [vmem:[#allocation2 + $0x2a8] sm:$0xff]  ;;  %v110_v56 = vld [vmem:[#allocation2 + $0x298] sm:$0xff]  ;;  %v344_v58 = vpack.c.bf16 %v103_v50, %v99_v49 }
  0x2e   :  { %v114_v57 = vld [vmem:[#allocation2 + $0x2b8] sm:$0xff]  ;;  %v408_v59 = vpack.c.bf16 %v105_v53, %v101_v51  ;;  %v346_v60 = vpack.c.bf16 %v112_v55, %v108_v54  ;;  %v107_v61 = vld [vmem:[#allocation2 + $0x280] sm:$0xff]  ;;  %v109_v63 = vld [vmem:[#allocation2 + $0x290] sm:$0xff] }
  0x2f   :  { %333 = vmatpush1.bf16.msra.mxu0 %v332_v22  ;;  %v111_v62 = vld [vmem:[#allocation2 + $0x2a0] sm:$0xff]  ;;  %v410_v0 = vpack.c.bf16 %v114_v57, %v110_v56  ;;  %v113_v1 = vld [vmem:[#allocation2 + $0x2b0] sm:$0xff]  ;;  %v116_v2 = vld [vmem:[#allocation2 + $0x2c8] sm:$0xff] }
  0x30   :  { %397 = vmatpush1.bf16.msra.mxu1 %v396_v23  ;;  %335 = vmatprep.subr.bf16.mxu0 %v334_v24  ;;  %v120_v3 = vld [vmem:[#allocation2 + $0x2e8] sm:$0xff]  ;;  %v118_v4 = vld [vmem:[#allocation2 + $0x2d8] sm:$0xff]  ;;  %v348_v6 = vpack.c.bf16 %v111_v62, %v107_v61  ;;  %v115_v7 = vld [vmem:[#allocation2 + $0x2c0] sm:$0xff]  ;;  %v412_v8 = vpack.c.bf16 %v113_v1, %v109_v63 }
  0x31   :  { %399 = vmatprep.subr.bf16.mxu1 %v398_v28  ;;  %v122_v5 = vld [vmem:[#allocation2 + $0x2f8] sm:$0xff]  ;;  %v350_v9 = vpack.c.bf16 %v120_v3, %v116_v2  ;;  %v119_v10 = vld [vmem:[#allocation2 + $0x2e0] sm:$0xff]  ;;  %v117_v11 = vld [vmem:[#allocation2 + $0x2d0] sm:$0xff] }
  0x32   :  { %v121_v12 = vld [vmem:[#allocation2 + $0x2f0] sm:$0xff]  ;;  %v414_v13 = vpack.c.bf16 %v122_v5, %v118_v4  ;;  %v124_v14 = vld [vmem:[#allocation2 + $0x308] sm:$0xff]  ;;  %v126_v17 = vld [vmem:[#allocation2 + $0x318] sm:$0xff]  ;;  %v352_v19 = vpack.c.bf16 %v119_v10, %v115_v7 }
  0x33   :  { %337 = vmatpush1.bf16.msra.mxu0 %v336_v34  ;;  %v128_v15 = vld [vmem:[#allocation2 + $0x328] sm:$0xff]  ;;  %v130_v18 = vld [vmem:[#allocation2 + $0x338] sm:$0xff]  ;;  %v416_v20 = vpack.c.bf16 %v121_v12, %v117_v11  ;;  %v123_v22 = vld [vmem:[#allocation2 + $0x300] sm:$0xff] }
  0x34   :  { %401 = vmatpush1.bf16.msra.mxu1 %v400_v35  ;;  %339 = vmatprep.subr.bf16.mxu0 %v338_v36  ;;  %v26_v16 = vld [vmem:[%s509_s0 + $0x8] sm:$0xff]  ;;  %v354_v21 = vpack.c.bf16 %v128_v15, %v124_v14  ;;  %v127_v23 = vld [vmem:[#allocation2 + $0x320] sm:$0xff]  ;;  %v125_v24 = vld [vmem:[#allocation2 + $0x310] sm:$0xff]  ;;  %v418_v25 = vpack.c.bf16 %v130_v18, %v126_v17 }
  0x35   :  { %403 = vmatprep.subr.bf16.mxu1 %v402_v40  ;;  %219 = vmatprep.mubr.f32.mxu0 %v26_v16  ;;  %v129_v26 = vld [vmem:[#allocation2 + $0x330] sm:$0xff]  ;;  %v132_v27 = vld [vmem:[#allocation2 + $0x348] sm:$0xff]  ;;  %v134_v29 = vld [vmem:[#allocation2 + $0x358] sm:$0xff]  ;;  %v356_v31 = vpack.c.bf16 %v127_v23, %v123_v22 }
  0x36   :  { %290 = vmatprep.mubr.f32.mxu1 %v26_v16  ;;  %v136_v28 = vld [vmem:[#allocation2 + $0x368] sm:$0xff]  ;;  %v138_v30 = vld [vmem:[#allocation2 + $0x378] sm:$0xff]  ;;  %v420_v32 = vpack.c.bf16 %v129_v26, %v125_v24  ;;  %v131_v34 = vld [vmem:[#allocation2 + $0x340] sm:$0xff] }
  0x37   :  { %341 = vmatpush1.bf16.msra.mxu0 %v340_v46  ;;  %v358_v33 = vpack.c.bf16 %v136_v28, %v132_v27  ;;  %v135_v35 = vld [vmem:[#allocation2 + $0x360] sm:$0xff]  ;;  %v133_v36 = vld [vmem:[#allocation2 + $0x350] sm:$0xff]  ;;  %v422_v37 = vpack.c.bf16 %v138_v30, %v134_v29  ;;  %v140_v39 = vld [vmem:[#allocation2 + $0x388] sm:$0xff] }
  0x38   :  { %405 = vmatpush1.bf16.msra.mxu1 %v404_v47  ;;  %343 = vmatprep.subr.bf16.mxu0 %v342_v48  ;;  %v137_v38 = vld [vmem:[#allocation2 + $0x370] sm:$0xff]  ;;  %v144_v40 = vld [vmem:[#allocation2 + $0x3a8] sm:$0xff]  ;;  %v142_v41 = vld [vmem:[#allocation2 + $0x398] sm:$0xff]  ;;  %v360_v43 = vpack.c.bf16 %v135_v35, %v131_v34 }
  0x39   :  { %407 = vmatprep.subr.bf16.mxu1 %v406_v52  ;;  %v146_v42 = vld [vmem:[#allocation2 + $0x3b8] sm:$0xff]  ;;  %v424_v44 = vpack.c.bf16 %v137_v38, %v133_v36  ;;  %v362_v45 = vpack.c.bf16 %v144_v40, %v140_v39  ;;  %v139_v46 = vld [vmem:[#allocation2 + $0x380] sm:$0xff]  ;;  %v141_v48 = vld [vmem:[#allocation2 + $0x390] sm:$0xff] }
  0x3a   :  { %v143_v47 = vld [vmem:[#allocation2 + $0x3a0] sm:$0xff]  ;;  %v426_v49 = vpack.c.bf16 %v146_v42, %v142_v41  ;;  %v145_v50 = vld [vmem:[#allocation2 + $0x3b0] sm:$0xff]  ;;  %v148_v51 = vld [vmem:[#allocation2 + $0x3c8] sm:$0xff] }
  0x3b   :  { %345 = vmatpush1.bf16.msra.mxu0 %v344_v58  ;;  %v152_v52 = vld [vmem:[#allocation2 + $0x3e8] sm:$0xff]  ;;  %v150_v53 = vld [vmem:[#allocation2 + $0x3d8] sm:$0xff]  ;;  %v364_v55 = vpack.c.bf16 %v143_v47, %v139_v46  ;;  %v428_v56 = vpack.c.bf16 %v145_v50, %v141_v48  ;;  %v147_v58 = vld [vmem:[#allocation2 + $0x3c0] sm:$0xff] }
  0x3c   :  { %409 = vmatpush1.bf16.msra.mxu1 %v408_v59  ;;  %347 = vmatprep.subr.bf16.mxu0 %v346_v60  ;;  %v154_v54 = vld [vmem:[#allocation2 + $0x3f8] sm:$0xff]  ;;  %v366_v57 = vpack.c.bf16 %v152_v52, %v148_v51  ;;  %v151_v59 = vld [vmem:[#allocation2 + $0x3e0] sm:$0xff]  ;;  %v149_v61 = vld [vmem:[#allocation2 + $0x3d0] sm:$0xff] }
  0x3d   :  { %411 = vmatprep.subr.bf16.mxu1 %v410_v0  ;;  %v430_v60 = vpack.c.bf16 %v154_v54, %v150_v53  ;;  %v153_v62 = vld [vmem:[#allocation2 + $0x3f0] sm:$0xff]  ;;  %v368_v63 = vpack.c.bf16 %v151_v59, %v147_v58  ;;  %v25_v1 = vld [vmem:[%s509_s0] sm:$0xff] }
  0x3e   :  { %v432_v0 = vpack.c.bf16 %v153_v62, %v149_v61 }
  0x3f   :  { %349 = vmatpush1.bf16.msra.mxu0 %v348_v6 }
  0x40   :  { %413 = vmatpush1.bf16.msra.mxu1 %v412_v8  ;;  %351 = vmatprep.subr.bf16.mxu0 %v350_v9 }
  0x41   :  { %415 = vmatprep.subr.bf16.mxu1 %v414_v13 }
  0x43   :  { %353 = vmatpush1.bf16.msra.mxu0 %v352_v19 }
  0x44   :  { %417 = vmatpush1.bf16.msra.mxu1 %v416_v20  ;;  %355 = vmatprep.subr.bf16.mxu0 %v354_v21 }
  0x45   :  { %419 = vmatprep.subr.bf16.mxu1 %v418_v25 }
  0x47   :  { %357 = vmatpush1.bf16.msra.mxu0 %v356_v31 }
  0x48   :  { %421 = vmatpush1.bf16.msra.mxu1 %v420_v32  ;;  %359 = vmatprep.subr.bf16.mxu0 %v358_v33 }
  0x49   :  { %423 = vmatprep.subr.bf16.mxu1 %v422_v37 }
  0x4b   :  { %361 = vmatpush1.bf16.msra.mxu0 %v360_v43 }
  0x4c   :  { %425 = vmatpush1.bf16.msra.mxu1 %v424_v44  ;;  %363 = vmatprep.subr.bf16.mxu0 %v362_v45 }
  0x4d   :  { %427 = vmatprep.subr.bf16.mxu1 %v426_v49 }
  0x4f   :  { %365 = vmatpush1.bf16.msra.mxu0 %v364_v55 }
  0x50   :  { %429 = vmatpush1.bf16.msra.mxu1 %v428_v56  ;;  %367 = vmatprep.subr.bf16.mxu0 %v366_v57 }
  0x51   :  { %431 = vmatprep.subr.bf16.mxu1 %v430_v60 }
  0x53   :  { %369 = vmatpush1.bf16.msra.mxu0 %v368_v63 }
  0x54   :  { %433 = vmatpush1.bf16.msra.mxu1 %v432_v0 }
  0x56   :  { %220 = vmatmul.mubr.f32.vlgmr.msra.gmra.mrb[0].mxu0 %v25_v1 }
  0x57   :  { %291 = vmatmul.mubr.f32.vlgmr.msra.gmra.mrb[0].mxu1 %v25_v1 }
 0x129   :  { %v221_v2 = vpop.f32.mrb[0].mxu0 }
 0x12a   :  { %297 = vst [vmem:[%s511_s2] sm:$0xff] %v221_v2  ;;  %v292_v3 = vpop.f32.mrb[0].mxu1  ;;  %v223_v4 = vpop.f32.mrb[1].mxu0 }
 0x12b   :  { %299 = vst [vmem:[%s511_s2 + $0x10] sm:$0xff] %v292_v3  ;;  %298 = vst [vmem:[%s511_s2 + $0x8] sm:$0xff] %v223_v4  ;;  %v294_v5 = vpop.f32.mrb[1].mxu1 }
 0x12c   :  { %300 = vst [vmem:[%s511_s2 + $0x18] sm:$0xff] %v294_v5 }
 0x12d   :  { %305 = vsyncpa [#allocation3], 1 }

</bundles_post_ra>
